<compile_context>
chip_gen: v7x
topology: tpu7x:2x2x1
jax: 0.10.0
libtpu: 0.0.40
codegen_flags: <defaults>
</compile_context>

<pallas_src>
import functools

import jax
import jax.numpy as jnp
from jax.experimental import pallas as pl
from jax.experimental.pallas import tpu as pltpu


def _per_layer_embed_kernel(ids_ref, table_ref, o_ref, sem_ref, *, tps):
    """Gather `tps` tokens' (L, D) slabs straight from HBM into the output block.

    ids_ref   : (T_pad,) int32 in SMEM        (scalar-prefetched token ids)
    table_ref : (V, L, D) in HBM              (memory_space=pl.ANY, no auto-DMA)
    o_ref     : (tps, L, D) VMEM output block for this grid step
    sem_ref   : (tps,) DMA semaphores
    """
    base = pl.program_id(0) * tps
    copies = []
    for j in range(tps):                        # static unroll; issues tps DMAs
        tok = ids_ref[base + j]
        cp = pltpu.make_async_copy(table_ref.at[tok], o_ref.at[j], sem_ref.at[j])
        cp.start()
        copies.append(cp)
    for cp in copies:                           # drain: all slabs landed in o_ref
        cp.wait()


def per_layer_embed_pallas(token_ids, table_vld, *, tokens_per_step=64):
    """token_ids: (T,) int; table_vld: (V, L, D). Returns (T, L, D)."""
    T = token_ids.shape[0]
    V, L, D = table_vld.shape
    assert D % 128 == 0, "embedding_dim must be a multiple of 128 (lane-dense output)"

    # torch.clamp(token_ids, 0, vocab-1)
    ids = jnp.clip(token_ids.astype(jnp.int32), 0, V - 1)

    # Keep >= 2 grid steps whenever possible so v7x megacore can split the
    # "parallel" token axis across both TensorCores.
    tps = max(1, min(int(tokens_per_step), (T + 1) // 2))

    # Pad token count up to a multiple of tps (padded tokens gather row 0 and
    # are sliced off below — dead DMA work only, never observed).
    T_pad = ((T + tps - 1) // tps) * tps
    if T_pad != T:
        ids = jnp.pad(ids, (0, T_pad - T))
    grid = (T_pad // tps,)

    itemsize = table_vld.dtype.itemsize
    out = pl.pallas_call(
        functools.partial(_per_layer_embed_kernel, tps=tps),
        out_shape=jax.ShapeDtypeStruct((T_pad, L, D), table_vld.dtype),
        grid_spec=pltpu.PrefetchScalarGridSpec(
            num_scalar_prefetch=1,
            grid=grid,
            in_specs=[pl.BlockSpec(memory_space=pl.ANY)],        # table stays in HBM
            out_specs=pl.BlockSpec((tps, L, D), lambda i, ids_ref: (i, 0, 0)),
            scratch_shapes=[pltpu.SemaphoreType.DMA((tps,))],
        ),
        compiler_params=pltpu.CompilerParams(
            dimension_semantics=("parallel",),
        ),
        cost_estimate=pl.CostEstimate(
            flops=0,
            transcendentals=0,
            bytes_accessed=2 * T_pad * L * D * itemsize + 4 * T_pad,
        ),
    )(ids, table_vld)

    return out[:T]


class PerLayerEmbedderPallas:
    """JAX/Pallas equivalent of the PyTorch PerLayerEmbedder module."""

    def __init__(self, vocab_size=262144, embedding_dim=256, num_layers=30,
                 key=None, dtype=jnp.float32, tokens_per_step=64):
        # NOTE: dtype=jnp.bfloat16 is strongly recommended for the real
        # 262144 x 30 x 256 table (halves HBM traffic and capacity).
        self.vocab_size = vocab_size
        self.embedding_dim = embedding_dim
        self.num_layers = num_layers
        self.tokens_per_step = tokens_per_step
        key = jax.random.PRNGKey(0) if key is None else key
        # nn.Embedding default init ~ N(0, 1); "PyTorch layout" (L, V, D)
        emb_lvd = jax.random.normal(key, (num_layers, vocab_size, embedding_dim), dtype)
        # Kernel layout: (V, L, D) so one token's per-layer rows are one slab
        # -> a single DMA per gathered token.
        self.table_vld = jnp.transpose(emb_lvd, (1, 0, 2))

    def __call__(self, token_ids):
        B, S = token_ids.shape
        flat = token_ids.reshape(B * S)
        out = per_layer_embed_pallas(
            flat, self.table_vld, tokens_per_step=self.tokens_per_step
        )                                                         # (B*S, L, D)
        return out.reshape(B, S, self.num_layers, self.embedding_dim)

    def reference(self, token_ids):
        ids = jnp.clip(token_ids, 0, self.vocab_size - 1)
        return jnp.take(self.table_vld, ids, axis=0)              # (B, S, L, D)


if __name__ == "__main__":
    key = jax.random.PRNGKey(0)
    k_param, k_ids = jax.random.split(key)

    # Small shapes consistent with the module (dim kept at the real 256,
    # a multiple of 128 for lane-dense output blocks).
    vocab_size, embedding_dim, num_layers = 512, 256, 4
    batch, seq = 2, 8

    embedder = PerLayerEmbedderPallas(
        vocab_size=vocab_size, embedding_dim=embedding_dim,
        num_layers=num_layers, key=k_param, dtype=jnp.float32,
    )

    # Include out-of-range ids to exercise the clamp path.
    token_ids = jax.random.randint(
        k_ids, (batch, seq), minval=-4, maxval=vocab_size + 4, dtype=jnp.int32
    )

    out = embedder(token_ids)
    jax.block_until_ready(out)

    ref = embedder.reference(token_ids)
    assert out.shape == (batch, seq, num_layers, embedding_dim)
    assert jnp.allclose(out, ref), "mismatch vs pure-JAX reference"

    # Second check: odd token count to exercise the padding + slice path.
    flat_ids = jax.random.randint(
        jax.random.PRNGKey(1), (13,), minval=0, maxval=vocab_size, dtype=jnp.int32
    )
    out2 = per_layer_embed_pallas(flat_ids, embedder.table_vld, tokens_per_step=8)
    jax.block_until_ready(out2)
    ref2 = jnp.take(embedder.table_vld, flat_ids, axis=0)
    assert out2.shape == (13, num_layers, embedding_dim)
    assert jnp.allclose(out2, ref2), "mismatch vs pure-JAX reference (padded path)"

    print("KERNEL_OK")
</pallas_src>

<mosaic_0001>
module attributes {stable_mosaic.version = 11 : i64} {
  func.func @_per_layer_embed_kernel(%arg0: i32, %arg1: memref<16xi32, #tpu.memory_space<smem>>, %arg2: memref<512x4x256xf32, #tpu.memory_space<any>>, %arg3: memref<8x4x256xf32, #tpu.memory_space<vmem>>, %arg4: memref<8x!tpu.dma_semaphore, #tpu.memory_space<semaphore_mem>>) attributes {dimension_semantics = [#tpu.dimension_semantics<parallel>], iteration_bounds = array<i64: 2>, scalar_prefetch = 1 : i64, scratch_operands = 1 : i64, tpu.core_type = #tpu.core_type<tc>, window_params = [{}, {transform_indices = @transform_1, window_bounds = array<i64: 8, 4, 256>}]} {
    %c8_i32 = arith.constant 8 : i32
    %0 = arith.muli %arg0, %c8_i32 : i32
    %c0_i32 = arith.constant 0 : i32
    %1 = arith.addi %0, %c0_i32 : i32
    %2 = arith.index_cast %1 : i32 to index
    %3 = memref.load %arg1[%2] : memref<16xi32, #tpu.memory_space<smem>>
    %c0_i32_0 = arith.constant 0 : i32
    %c0_i32_1 = arith.constant 0 : i32
    %c0_i32_2 = arith.constant 0 : i32
    %c0_i32_3 = arith.constant 0 : i32
    %4 = tpu.memref_slice %arg2[%3, %c0_i32_2, %c0_i32_3] : memref<512x4x256xf32, #tpu.memory_space<any>> -> memref<1x4x256xf32, #tpu.memory_space<any>>
    %5 = tpu.memref_squeeze %4 : memref<1x4x256xf32, #tpu.memory_space<any>> -> memref<4x256xf32, #tpu.memory_space<any>>
    %c0_i32_4 = arith.constant 0 : i32
    %c0_i32_5 = arith.constant 0 : i32
    %6 = tpu.memref_slice %arg3[%c0_i32_0, %c0_i32_4, %c0_i32_5] : memref<8x4x256xf32, #tpu.memory_space<vmem>> -> memref<1x4x256xf32, #tpu.memory_space<vmem>>
    %7 = tpu.memref_squeeze %6 : memref<1x4x256xf32, #tpu.memory_space<vmem>> -> memref<4x256xf32, #tpu.memory_space<vmem>>
    %8 = tpu.memref_slice %arg4[%c0_i32_1] : memref<8x!tpu.dma_semaphore, #tpu.memory_space<semaphore_mem>> -> memref<1x!tpu.dma_semaphore, #tpu.memory_space<semaphore_mem>>
    %9 = tpu.memref_squeeze %8 : memref<1x!tpu.dma_semaphore, #tpu.memory_space<semaphore_mem>> -> memref<!tpu.dma_semaphore, #tpu.memory_space<semaphore_mem>>
    tpu.enqueue_dma source(%5 : memref<4x256xf32, #tpu.memory_space<any>>) target(%7 : memref<4x256xf32, #tpu.memory_space<vmem>>) target_semaphore(%9 : memref<!tpu.dma_semaphore, #tpu.memory_space<semaphore_mem>>)
    %c1_i32 = arith.constant 1 : i32
    %10 = arith.addi %0, %c1_i32 : i32
    %11 = arith.index_cast %10 : i32 to index
    %12 = memref.load %arg1[%11] : memref<16xi32, #tpu.memory_space<smem>>
    %c1_i32_6 = arith.constant 1 : i32
    %c1_i32_7 = arith.constant 1 : i32
    %c0_i32_8 = arith.constant 0 : i32
    %c0_i32_9 = arith.constant 0 : i32
    %13 = tpu.memref_slice %arg2[%12, %c0_i32_8, %c0_i32_9] : memref<512x4x256xf32, #tpu.memory_space<any>> -> memref<1x4x256xf32, #tpu.memory_space<any>>
    %14 = tpu.memref_squeeze %13 : memref<1x4x256xf32, #tpu.memory_space<any>> -> memref<4x256xf32, #tpu.memory_space<any>>
    %c0_i32_10 = arith.constant 0 : i32
    %c0_i32_11 = arith.constant 0 : i32
    %15 = tpu.memref_slice %arg3[%c1_i32_6, %c0_i32_10, %c0_i32_11] : memref<8x4x256xf32, #tpu.memory_space<vmem>> -> memref<1x4x256xf32, #tpu.memory_space<vmem>>
    %16 = tpu.memref_squeeze %15 : memref<1x4x256xf32, #tpu.memory_space<vmem>> -> memref<4x256xf32, #tpu.memory_space<vmem>>
    %17 = tpu.memref_slice %arg4[%c1_i32_7] : memref<8x!tpu.dma_semaphore, #tpu.memory_space<semaphore_mem>> -> memref<1x!tpu.dma_semaphore, #tpu.memory_space<semaphore_mem>>
    %18 = tpu.memref_squeeze %17 : memref<1x!tpu.dma_semaphore, #tpu.memory_space<semaphore_mem>> -> memref<!tpu.dma_semaphore, #tpu.memory_space<semaphore_mem>>
    tpu.enqueue_dma source(%14 : memref<4x256xf32, #tpu.memory_space<any>>) target(%16 : memref<4x256xf32, #tpu.memory_space<vmem>>) target_semaphore(%18 : memref<!tpu.dma_semaphore, #tpu.memory_space<semaphore_mem>>)
    %c2_i32 = arith.constant 2 : i32
    %19 = arith.addi %0, %c2_i32 : i32
    %20 = arith.index_cast %19 : i32 to index
    %21 = memref.load %arg1[%20] : memref<16xi32, #tpu.memory_space<smem>>
    %c2_i32_12 = arith.constant 2 : i32
    %c2_i32_13 = arith.constant 2 : i32
    %c0_i32_14 = arith.constant 0 : i32
    %c0_i32_15 = arith.constant 0 : i32
    %22 = tpu.memref_slice %arg2[%21, %c0_i32_14, %c0_i32_15] : memref<512x4x256xf32, #tpu.memory_space<any>> -> memref<1x4x256xf32, #tpu.memory_space<any>>
    %23 = tpu.memref_squeeze %22 : memref<1x4x256xf32, #tpu.memory_space<any>> -> memref<4x256xf32, #tpu.memory_space<any>>
    %c0_i32_16 = arith.constant 0 : i32
    %c0_i32_17 = arith.constant 0 : i32
    %24 = tpu.memref_slice %arg3[%c2_i32_12, %c0_i32_16, %c0_i32_17] : memref<8x4x256xf32, #tpu.memory_space<vmem>> -> memref<1x4x256xf32, #tpu.memory_space<vmem>>
    %25 = tpu.memref_squeeze %24 : memref<1x4x256xf32, #tpu.memory_space<vmem>> -> memref<4x256xf32, #tpu.memory_space<vmem>>
    %26 = tpu.memref_slice %arg4[%c2_i32_13] : memref<8x!tpu.dma_semaphore, #tpu.memory_space<semaphore_mem>> -> memref<1x!tpu.dma_semaphore, #tpu.memory_space<semaphore_mem>>
    %27 = tpu.memref_squeeze %26 : memref<1x!tpu.dma_semaphore, #tpu.memory_space<semaphore_mem>> -> memref<!tpu.dma_semaphore, #tpu.memory_space<semaphore_mem>>
    tpu.enqueue_dma source(%23 : memref<4x256xf32, #tpu.memory_space<any>>) target(%25 : memref<4x256xf32, #tpu.memory_space<vmem>>) target_semaphore(%27 : memref<!tpu.dma_semaphore, #tpu.memory_space<semaphore_mem>>)
    %c3_i32 = arith.constant 3 : i32
    %28 = arith.addi %0, %c3_i32 : i32
    %29 = arith.index_cast %28 : i32 to index
    %30 = memref.load %arg1[%29] : memref<16xi32, #tpu.memory_space<smem>>
    %c3_i32_18 = arith.constant 3 : i32
    %c3_i32_19 = arith.constant 3 : i32
    %c0_i32_20 = arith.constant 0 : i32
    %c0_i32_21 = arith.constant 0 : i32
    %31 = tpu.memref_slice %arg2[%30, %c0_i32_20, %c0_i32_21] : memref<512x4x256xf32, #tpu.memory_space<any>> -> memref<1x4x256xf32, #tpu.memory_space<any>>
    %32 = tpu.memref_squeeze %31 : memref<1x4x256xf32, #tpu.memory_space<any>> -> memref<4x256xf32, #tpu.memory_space<any>>
    %c0_i32_22 = arith.constant 0 : i32
    %c0_i32_23 = arith.constant 0 : i32
    %33 = tpu.memref_slice %arg3[%c3_i32_18, %c0_i32_22, %c0_i32_23] : memref<8x4x256xf32, #tpu.memory_space<vmem>> -> memref<1x4x256xf32, #tpu.memory_space<vmem>>
    %34 = tpu.memref_squeeze %33 : memref<1x4x256xf32, #tpu.memory_space<vmem>> -> memref<4x256xf32, #tpu.memory_space<vmem>>
    %35 = tpu.memref_slice %arg4[%c3_i32_19] : memref<8x!tpu.dma_semaphore, #tpu.memory_space<semaphore_mem>> -> memref<1x!tpu.dma_semaphore, #tpu.memory_space<semaphore_mem>>
    %36 = tpu.memref_squeeze %35 : memref<1x!tpu.dma_semaphore, #tpu.memory_space<semaphore_mem>> -> memref<!tpu.dma_semaphore, #tpu.memory_space<semaphore_mem>>
    tpu.enqueue_dma source(%32 : memref<4x256xf32, #tpu.memory_space<any>>) target(%34 : memref<4x256xf32, #tpu.memory_space<vmem>>) target_semaphore(%36 : memref<!tpu.dma_semaphore, #tpu.memory_space<semaphore_mem>>)
    %c4_i32 = arith.constant 4 : i32
    %37 = arith.addi %0, %c4_i32 : i32
    %38 = arith.index_cast %37 : i32 to index
    %39 = memref.load %arg1[%38] : memref<16xi32, #tpu.memory_space<smem>>
    %c4_i32_24 = arith.constant 4 : i32
    %c4_i32_25 = arith.constant 4 : i32
    %c0_i32_26 = arith.constant 0 : i32
    %c0_i32_27 = arith.constant 0 : i32
    %40 = tpu.memref_slice %arg2[%39, %c0_i32_26, %c0_i32_27] : memref<512x4x256xf32, #tpu.memory_space<any>> -> memref<1x4x256xf32, #tpu.memory_space<any>>
    %41 = tpu.memref_squeeze %40 : memref<1x4x256xf32, #tpu.memory_space<any>> -> memref<4x256xf32, #tpu.memory_space<any>>
    %c0_i32_28 = arith.constant 0 : i32
    %c0_i32_29 = arith.constant 0 : i32
    %42 = tpu.memref_slice %arg3[%c4_i32_24, %c0_i32_28, %c0_i32_29] : memref<8x4x256xf32, #tpu.memory_space<vmem>> -> memref<1x4x256xf32, #tpu.memory_space<vmem>>
    %43 = tpu.memref_squeeze %42 : memref<1x4x256xf32, #tpu.memory_space<vmem>> -> memref<4x256xf32, #tpu.memory_space<vmem>>
    %44 = tpu.memref_slice %arg4[%c4_i32_25] : memref<8x!tpu.dma_semaphore, #tpu.memory_space<semaphore_mem>> -> memref<1x!tpu.dma_semaphore, #tpu.memory_space<semaphore_mem>>
    %45 = tpu.memref_squeeze %44 : memref<1x!tpu.dma_semaphore, #tpu.memory_space<semaphore_mem>> -> memref<!tpu.dma_semaphore, #tpu.memory_space<semaphore_mem>>
    tpu.enqueue_dma source(%41 : memref<4x256xf32, #tpu.memory_space<any>>) target(%43 : memref<4x256xf32, #tpu.memory_space<vmem>>) target_semaphore(%45 : memref<!tpu.dma_semaphore, #tpu.memory_space<semaphore_mem>>)
    %c5_i32 = arith.constant 5 : i32
    %46 = arith.addi %0, %c5_i32 : i32
    %47 = arith.index_cast %46 : i32 to index
    %48 = memref.load %arg1[%47] : memref<16xi32, #tpu.memory_space<smem>>
    %c5_i32_30 = arith.constant 5 : i32
    %c5_i32_31 = arith.constant 5 : i32
    %c0_i32_32 = arith.constant 0 : i32
    %c0_i32_33 = arith.constant 0 : i32
    %49 = tpu.memref_slice %arg2[%48, %c0_i32_32, %c0_i32_33] : memref<512x4x256xf32, #tpu.memory_space<any>> -> memref<1x4x256xf32, #tpu.memory_space<any>>
    %50 = tpu.memref_squeeze %49 : memref<1x4x256xf32, #tpu.memory_space<any>> -> memref<4x256xf32, #tpu.memory_space<any>>
    %c0_i32_34 = arith.constant 0 : i32
    %c0_i32_35 = arith.constant 0 : i32
    %51 = tpu.memref_slice %arg3[%c5_i32_30, %c0_i32_34, %c0_i32_35] : memref<8x4x256xf32, #tpu.memory_space<vmem>> -> memref<1x4x256xf32, #tpu.memory_space<vmem>>
    %52 = tpu.memref_squeeze %51 : memref<1x4x256xf32, #tpu.memory_space<vmem>> -> memref<4x256xf32, #tpu.memory_space<vmem>>
    %53 = tpu.memref_slice %arg4[%c5_i32_31] : memref<8x!tpu.dma_semaphore, #tpu.memory_space<semaphore_mem>> -> memref<1x!tpu.dma_semaphore, #tpu.memory_space<semaphore_mem>>
    %54 = tpu.memref_squeeze %53 : memref<1x!tpu.dma_semaphore, #tpu.memory_space<semaphore_mem>> -> memref<!tpu.dma_semaphore, #tpu.memory_space<semaphore_mem>>
    tpu.enqueue_dma source(%50 : memref<4x256xf32, #tpu.memory_space<any>>) target(%52 : memref<4x256xf32, #tpu.memory_space<vmem>>) target_semaphore(%54 : memref<!tpu.dma_semaphore, #tpu.memory_space<semaphore_mem>>)
    %c6_i32 = arith.constant 6 : i32
    %55 = arith.addi %0, %c6_i32 : i32
    %56 = arith.index_cast %55 : i32 to index
    %57 = memref.load %arg1[%56] : memref<16xi32, #tpu.memory_space<smem>>
    %c6_i32_36 = arith.constant 6 : i32
    %c6_i32_37 = arith.constant 6 : i32
    %c0_i32_38 = arith.constant 0 : i32
    %c0_i32_39 = arith.constant 0 : i32
    %58 = tpu.memref_slice %arg2[%57, %c0_i32_38, %c0_i32_39] : memref<512x4x256xf32, #tpu.memory_space<any>> -> memref<1x4x256xf32, #tpu.memory_space<any>>
    %59 = tpu.memref_squeeze %58 : memref<1x4x256xf32, #tpu.memory_space<any>> -> memref<4x256xf32, #tpu.memory_space<any>>
    %c0_i32_40 = arith.constant 0 : i32
    %c0_i32_41 = arith.constant 0 : i32
    %60 = tpu.memref_slice %arg3[%c6_i32_36, %c0_i32_40, %c0_i32_41] : memref<8x4x256xf32, #tpu.memory_space<vmem>> -> memref<1x4x256xf32, #tpu.memory_space<vmem>>
    %61 = tpu.memref_squeeze %60 : memref<1x4x256xf32, #tpu.memory_space<vmem>> -> memref<4x256xf32, #tpu.memory_space<vmem>>
    %62 = tpu.memref_slice %arg4[%c6_i32_37] : memref<8x!tpu.dma_semaphore, #tpu.memory_space<semaphore_mem>> -> memref<1x!tpu.dma_semaphore, #tpu.memory_space<semaphore_mem>>
    %63 = tpu.memref_squeeze %62 : memref<1x!tpu.dma_semaphore, #tpu.memory_space<semaphore_mem>> -> memref<!tpu.dma_semaphore, #tpu.memory_space<semaphore_mem>>
    tpu.enqueue_dma source(%59 : memref<4x256xf32, #tpu.memory_space<any>>) target(%61 : memref<4x256xf32, #tpu.memory_space<vmem>>) target_semaphore(%63 : memref<!tpu.dma_semaphore, #tpu.memory_space<semaphore_mem>>)
    %c7_i32 = arith.constant 7 : i32
    %64 = arith.addi %0, %c7_i32 : i32
    %65 = arith.index_cast %64 : i32 to index
    %66 = memref.load %arg1[%65] : memref<16xi32, #tpu.memory_space<smem>>
    %c7_i32_42 = arith.constant 7 : i32
    %c7_i32_43 = arith.constant 7 : i32
    %c0_i32_44 = arith.constant 0 : i32
    %c0_i32_45 = arith.constant 0 : i32
    %67 = tpu.memref_slice %arg2[%66, %c0_i32_44, %c0_i32_45] : memref<512x4x256xf32, #tpu.memory_space<any>> -> memref<1x4x256xf32, #tpu.memory_space<any>>
    %68 = tpu.memref_squeeze %67 : memref<1x4x256xf32, #tpu.memory_space<any>> -> memref<4x256xf32, #tpu.memory_space<any>>
    %c0_i32_46 = arith.constant 0 : i32
    %c0_i32_47 = arith.constant 0 : i32
    %69 = tpu.memref_slice %arg3[%c7_i32_42, %c0_i32_46, %c0_i32_47] : memref<8x4x256xf32, #tpu.memory_space<vmem>> -> memref<1x4x256xf32, #tpu.memory_space<vmem>>
    %70 = tpu.memref_squeeze %69 : memref<1x4x256xf32, #tpu.memory_space<vmem>> -> memref<4x256xf32, #tpu.memory_space<vmem>>
    %71 = tpu.memref_slice %arg4[%c7_i32_43] : memref<8x!tpu.dma_semaphore, #tpu.memory_space<semaphore_mem>> -> memref<1x!tpu.dma_semaphore, #tpu.memory_space<semaphore_mem>>
    %72 = tpu.memref_squeeze %71 : memref<1x!tpu.dma_semaphore, #tpu.memory_space<semaphore_mem>> -> memref<!tpu.dma_semaphore, #tpu.memory_space<semaphore_mem>>
    tpu.enqueue_dma source(%68 : memref<4x256xf32, #tpu.memory_space<any>>) target(%70 : memref<4x256xf32, #tpu.memory_space<vmem>>) target_semaphore(%72 : memref<!tpu.dma_semaphore, #tpu.memory_space<semaphore_mem>>)
    %c0_i32_48 = arith.constant 0 : i32
    %c0_i32_49 = arith.constant 0 : i32
    %c0_i32_50 = arith.constant 0 : i32
    %c0_i32_51 = arith.constant 0 : i32
    %73 = tpu.memref_slice %arg2[%3, %c0_i32_50, %c0_i32_51] : memref<512x4x256xf32, #tpu.memory_space<any>> -> memref<1x4x256xf32, #tpu.memory_space<any>>
    %74 = tpu.memref_squeeze %73 : memref<1x4x256xf32, #tpu.memory_space<any>> -> memref<4x256xf32, #tpu.memory_space<any>>
    %c0_i32_52 = arith.constant 0 : i32
    %c0_i32_53 = arith.constant 0 : i32
    %75 = tpu.memref_slice %arg3[%c0_i32_48, %c0_i32_52, %c0_i32_53] : memref<8x4x256xf32, #tpu.memory_space<vmem>> -> memref<1x4x256xf32, #tpu.memory_space<vmem>>
    %76 = tpu.memref_squeeze %75 : memref<1x4x256xf32, #tpu.memory_space<vmem>> -> memref<4x256xf32, #tpu.memory_space<vmem>>
    %77 = tpu.memref_slice %arg4[%c0_i32_49] : memref<8x!tpu.dma_semaphore, #tpu.memory_space<semaphore_mem>> -> memref<1x!tpu.dma_semaphore, #tpu.memory_space<semaphore_mem>>
    %78 = tpu.memref_squeeze %77 : memref<1x!tpu.dma_semaphore, #tpu.memory_space<semaphore_mem>> -> memref<!tpu.dma_semaphore, #tpu.memory_space<semaphore_mem>>
    tpu.wait_dma2 semaphore(%78 : memref<!tpu.dma_semaphore, #tpu.memory_space<semaphore_mem>>) src(%74 : memref<4x256xf32, #tpu.memory_space<any>>) dst(%76 : memref<4x256xf32, #tpu.memory_space<vmem>>)
    %c1_i32_54 = arith.constant 1 : i32
    %c1_i32_55 = arith.constant 1 : i32
    %c0_i32_56 = arith.constant 0 : i32
    %c0_i32_57 = arith.constant 0 : i32
    %79 = tpu.memref_slice %arg2[%12, %c0_i32_56, %c0_i32_57] : memref<512x4x256xf32, #tpu.memory_space<any>> -> memref<1x4x256xf32, #tpu.memory_space<any>>
    %80 = tpu.memref_squeeze %79 : memref<1x4x256xf32, #tpu.memory_space<any>> -> memref<4x256xf32, #tpu.memory_space<any>>
    %c0_i32_58 = arith.constant 0 : i32
    %c0_i32_59 = arith.constant 0 : i32
    %81 = tpu.memref_slice %arg3[%c1_i32_54, %c0_i32_58, %c0_i32_59] : memref<8x4x256xf32, #tpu.memory_space<vmem>> -> memref<1x4x256xf32, #tpu.memory_space<vmem>>
    %82 = tpu.memref_squeeze %81 : memref<1x4x256xf32, #tpu.memory_space<vmem>> -> memref<4x256xf32, #tpu.memory_space<vmem>>
    %83 = tpu.memref_slice %arg4[%c1_i32_55] : memref<8x!tpu.dma_semaphore, #tpu.memory_space<semaphore_mem>> -> memref<1x!tpu.dma_semaphore, #tpu.memory_space<semaphore_mem>>
    %84 = tpu.memref_squeeze %83 : memref<1x!tpu.dma_semaphore, #tpu.memory_space<semaphore_mem>> -> memref<!tpu.dma_semaphore, #tpu.memory_space<semaphore_mem>>
    tpu.wait_dma2 semaphore(%84 : memref<!tpu.dma_semaphore, #tpu.memory_space<semaphore_mem>>) src(%80 : memref<4x256xf32, #tpu.memory_space<any>>) dst(%82 : memref<4x256xf32, #tpu.memory_space<vmem>>)
    %c2_i32_60 = arith.constant 2 : i32
    %c2_i32_61 = arith.constant 2 : i32
    %c0_i32_62 = arith.constant 0 : i32
    %c0_i32_63 = arith.constant 0 : i32
    %85 = tpu.memref_slice %arg2[%21, %c0_i32_62, %c0_i32_63] : memref<512x4x256xf32, #tpu.memory_space<any>> -> memref<1x4x256xf32, #tpu.memory_space<any>>
    %86 = tpu.memref_squeeze %85 : memref<1x4x256xf32, #tpu.memory_space<any>> -> memref<4x256xf32, #tpu.memory_space<any>>
    %c0_i32_64 = arith.constant 0 : i32
    %c0_i32_65 = arith.constant 0 : i32
    %87 = tpu.memref_slice %arg3[%c2_i32_60, %c0_i32_64, %c0_i32_65] : memref<8x4x256xf32, #tpu.memory_space<vmem>> -> memref<1x4x256xf32, #tpu.memory_space<vmem>>
    %88 = tpu.memref_squeeze %87 : memref<1x4x256xf32, #tpu.memory_space<vmem>> -> memref<4x256xf32, #tpu.memory_space<vmem>>
    %89 = tpu.memref_slice %arg4[%c2_i32_61] : memref<8x!tpu.dma_semaphore, #tpu.memory_space<semaphore_mem>> -> memref<1x!tpu.dma_semaphore, #tpu.memory_space<semaphore_mem>>
    %90 = tpu.memref_squeeze %89 : memref<1x!tpu.dma_semaphore, #tpu.memory_space<semaphore_mem>> -> memref<!tpu.dma_semaphore, #tpu.memory_space<semaphore_mem>>
    tpu.wait_dma2 semaphore(%90 : memref<!tpu.dma_semaphore, #tpu.memory_space<semaphore_mem>>) src(%86 : memref<4x256xf32, #tpu.memory_space<any>>) dst(%88 : memref<4x256xf32, #tpu.memory_space<vmem>>)
    %c3_i32_66 = arith.constant 3 : i32
    %c3_i32_67 = arith.constant 3 : i32
    %c0_i32_68 = arith.constant 0 : i32
    %c0_i32_69 = arith.constant 0 : i32
    %91 = tpu.memref_slice %arg2[%30, %c0_i32_68, %c0_i32_69] : memref<512x4x256xf32, #tpu.memory_space<any>> -> memref<1x4x256xf32, #tpu.memory_space<any>>
    %92 = tpu.memref_squeeze %91 : memref<1x4x256xf32, #tpu.memory_space<any>> -> memref<4x256xf32, #tpu.memory_space<any>>
    %c0_i32_70 = arith.constant 0 : i32
    %c0_i32_71 = arith.constant 0 : i32
    %93 = tpu.memref_slice %arg3[%c3_i32_66, %c0_i32_70, %c0_i32_71] : memref<8x4x256xf32, #tpu.memory_space<vmem>> -> memref<1x4x256xf32, #tpu.memory_space<vmem>>
    %94 = tpu.memref_squeeze %93 : memref<1x4x256xf32, #tpu.memory_space<vmem>> -> memref<4x256xf32, #tpu.memory_space<vmem>>
    %95 = tpu.memref_slice %arg4[%c3_i32_67] : memref<8x!tpu.dma_semaphore, #tpu.memory_space<semaphore_mem>> -> memref<1x!tpu.dma_semaphore, #tpu.memory_space<semaphore_mem>>
    %96 = tpu.memref_squeeze %95 : memref<1x!tpu.dma_semaphore, #tpu.memory_space<semaphore_mem>> -> memref<!tpu.dma_semaphore, #tpu.memory_space<semaphore_mem>>
    tpu.wait_dma2 semaphore(%96 : memref<!tpu.dma_semaphore, #tpu.memory_space<semaphore_mem>>) src(%92 : memref<4x256xf32, #tpu.memory_space<any>>) dst(%94 : memref<4x256xf32, #tpu.memory_space<vmem>>)
    %c4_i32_72 = arith.constant 4 : i32
    %c4_i32_73 = arith.constant 4 : i32
    %c0_i32_74 = arith.constant 0 : i32
    %c0_i32_75 = arith.constant 0 : i32
    %97 = tpu.memref_slice %arg2[%39, %c0_i32_74, %c0_i32_75] : memref<512x4x256xf32, #tpu.memory_space<any>> -> memref<1x4x256xf32, #tpu.memory_space<any>>
    %98 = tpu.memref_squeeze %97 : memref<1x4x256xf32, #tpu.memory_space<any>> -> memref<4x256xf32, #tpu.memory_space<any>>
    %c0_i32_76 = arith.constant 0 : i32
    %c0_i32_77 = arith.constant 0 : i32
    %99 = tpu.memref_slice %arg3[%c4_i32_72, %c0_i32_76, %c0_i32_77] : memref<8x4x256xf32, #tpu.memory_space<vmem>> -> memref<1x4x256xf32, #tpu.memory_space<vmem>>
    %100 = tpu.memref_squeeze %99 : memref<1x4x256xf32, #tpu.memory_space<vmem>> -> memref<4x256xf32, #tpu.memory_space<vmem>>
    %101 = tpu.memref_slice %arg4[%c4_i32_73] : memref<8x!tpu.dma_semaphore, #tpu.memory_space<semaphore_mem>> -> memref<1x!tpu.dma_semaphore, #tpu.memory_space<semaphore_mem>>
    %102 = tpu.memref_squeeze %101 : memref<1x!tpu.dma_semaphore, #tpu.memory_space<semaphore_mem>> -> memref<!tpu.dma_semaphore, #tpu.memory_space<semaphore_mem>>
    tpu.wait_dma2 semaphore(%102 : memref<!tpu.dma_semaphore, #tpu.memory_space<semaphore_mem>>) src(%98 : memref<4x256xf32, #tpu.memory_space<any>>) dst(%100 : memref<4x256xf32, #tpu.memory_space<vmem>>)
    %c5_i32_78 = arith.constant 5 : i32
    %c5_i32_79 = arith.constant 5 : i32
    %c0_i32_80 = arith.constant 0 : i32
    %c0_i32_81 = arith.constant 0 : i32
    %103 = tpu.memref_slice %arg2[%48, %c0_i32_80, %c0_i32_81] : memref<512x4x256xf32, #tpu.memory_space<any>> -> memref<1x4x256xf32, #tpu.memory_space<any>>
    %104 = tpu.memref_squeeze %103 : memref<1x4x256xf32, #tpu.memory_space<any>> -> memref<4x256xf32, #tpu.memory_space<any>>
    %c0_i32_82 = arith.constant 0 : i32
    %c0_i32_83 = arith.constant 0 : i32
    %105 = tpu.memref_slice %arg3[%c5_i32_78, %c0_i32_82, %c0_i32_83] : memref<8x4x256xf32, #tpu.memory_space<vmem>> -> memref<1x4x256xf32, #tpu.memory_space<vmem>>
    %106 = tpu.memref_squeeze %105 : memref<1x4x256xf32, #tpu.memory_space<vmem>> -> memref<4x256xf32, #tpu.memory_space<vmem>>
    %107 = tpu.memref_slice %arg4[%c5_i32_79] : memref<8x!tpu.dma_semaphore, #tpu.memory_space<semaphore_mem>> -> memref<1x!tpu.dma_semaphore, #tpu.memory_space<semaphore_mem>>
    %108 = tpu.memref_squeeze %107 : memref<1x!tpu.dma_semaphore, #tpu.memory_space<semaphore_mem>> -> memref<!tpu.dma_semaphore, #tpu.memory_space<semaphore_mem>>
    tpu.wait_dma2 semaphore(%108 : memref<!tpu.dma_semaphore, #tpu.memory_space<semaphore_mem>>) src(%104 : memref<4x256xf32, #tpu.memory_space<any>>) dst(%106 : memref<4x256xf32, #tpu.memory_space<vmem>>)
    %c6_i32_84 = arith.constant 6 : i32
    %c6_i32_85 = arith.constant 6 : i32
    %c0_i32_86 = arith.constant 0 : i32
    %c0_i32_87 = arith.constant 0 : i32
    %109 = tpu.memref_slice %arg2[%57, %c0_i32_86, %c0_i32_87] : memref<512x4x256xf32, #tpu.memory_space<any>> -> memref<1x4x256xf32, #tpu.memory_space<any>>
    %110 = tpu.memref_squeeze %109 : memref<1x4x256xf32, #tpu.memory_space<any>> -> memref<4x256xf32, #tpu.memory_space<any>>
    %c0_i32_88 = arith.constant 0 : i32
    %c0_i32_89 = arith.constant 0 : i32
    %111 = tpu.memref_slice %arg3[%c6_i32_84, %c0_i32_88, %c0_i32_89] : memref<8x4x256xf32, #tpu.memory_space<vmem>> -> memref<1x4x256xf32, #tpu.memory_space<vmem>>
    %112 = tpu.memref_squeeze %111 : memref<1x4x256xf32, #tpu.memory_space<vmem>> -> memref<4x256xf32, #tpu.memory_space<vmem>>
    %113 = tpu.memref_slice %arg4[%c6_i32_85] : memref<8x!tpu.dma_semaphore, #tpu.memory_space<semaphore_mem>> -> memref<1x!tpu.dma_semaphore, #tpu.memory_space<semaphore_mem>>
    %114 = tpu.memref_squeeze %113 : memref<1x!tpu.dma_semaphore, #tpu.memory_space<semaphore_mem>> -> memref<!tpu.dma_semaphore, #tpu.memory_space<semaphore_mem>>
    tpu.wait_dma2 semaphore(%114 : memref<!tpu.dma_semaphore, #tpu.memory_space<semaphore_mem>>) src(%110 : memref<4x256xf32, #tpu.memory_space<any>>) dst(%112 : memref<4x256xf32, #tpu.memory_space<vmem>>)
    %c7_i32_90 = arith.constant 7 : i32
    %c7_i32_91 = arith.constant 7 : i32
    %c0_i32_92 = arith.constant 0 : i32
    %c0_i32_93 = arith.constant 0 : i32
    %115 = tpu.memref_slice %arg2[%66, %c0_i32_92, %c0_i32_93] : memref<512x4x256xf32, #tpu.memory_space<any>> -> memref<1x4x256xf32, #tpu.memory_space<any>>
    %116 = tpu.memref_squeeze %115 : memref<1x4x256xf32, #tpu.memory_space<any>> -> memref<4x256xf32, #tpu.memory_space<any>>
    %c0_i32_94 = arith.constant 0 : i32
    %c0_i32_95 = arith.constant 0 : i32
    %117 = tpu.memref_slice %arg3[%c7_i32_90, %c0_i32_94, %c0_i32_95] : memref<8x4x256xf32, #tpu.memory_space<vmem>> -> memref<1x4x256xf32, #tpu.memory_space<vmem>>
    %118 = tpu.memref_squeeze %117 : memref<1x4x256xf32, #tpu.memory_space<vmem>> -> memref<4x256xf32, #tpu.memory_space<vmem>>
    %119 = tpu.memref_slice %arg4[%c7_i32_91] : memref<8x!tpu.dma_semaphore, #tpu.memory_space<semaphore_mem>> -> memref<1x!tpu.dma_semaphore, #tpu.memory_space<semaphore_mem>>
    %120 = tpu.memref_squeeze %119 : memref<1x!tpu.dma_semaphore, #tpu.memory_space<semaphore_mem>> -> memref<!tpu.dma_semaphore, #tpu.memory_space<semaphore_mem>>
    tpu.wait_dma2 semaphore(%120 : memref<!tpu.dma_semaphore, #tpu.memory_space<semaphore_mem>>) src(%116 : memref<4x256xf32, #tpu.memory_space<any>>) dst(%118 : memref<4x256xf32, #tpu.memory_space<vmem>>)
    return
  }
  func.func @transform_1(%arg0: i32, %arg1: memref<16xi32, #tpu.memory_space<smem>>) -> (i32, i32, i32) {
    %c0_i32 = arith.constant 0 : i32
    %c0_i32_0 = arith.constant 0 : i32
    %c0_i32_1 = arith.constant 0 : i32
    return %arg0, %c0_i32, %c0_i32_0 : i32, i32, i32
  }
}

</mosaic_0001>

<bundles_post_ra>
// kernel: tpu_custom_call.1
= control target key start
LH: loop header
LB: loop body
LE: loop exit
PB: predicated region body
PF: predicated region fallthrough
CT: control target
= control target key end

     0   :  { %s1181_s0 = inlined_call_operand.hbm [shape: s32[16], index: 0, kind: input, shape index: {}]   ;;  %s1182_s1 = inlined_call_operand.hbm [shape: f32[512,4,256], index: 1, kind: input, shape index: {}]   ;;  %s1183_s2 = inlined_call_operand.hbm [shape: f32[16,4,256], index: 2, kind: output, shape index: {}]  }
   0x1   :  { %s461_s11 = scalar_lea.hbm %s1181_s0, 16 }
   0x2   :  { %p462_p0 = scmp.ne.s32.totalorder %s1181_s0, %s461_s11  ;;  %p465_p1 = scmp.lt.u32.totalorder %s461_s11, %s1181_s0 }
   0x4   :  { %p467_p2 = pnand %p465_p1, %p462_p0 }
   0x6   :  { %470 = shalt.err (!%p467_p2)  }
   0x7   :  { %s787_s16 = smov [#allocation4]  }
   0x8   :  { %8 = dma.hbm_to_smem %s1181_s0, 16, %s787_s16, [#allocation3] }
   0x9   :  { %737 = dma.done.wait [#allocation3], 16 }
   0xa   :  { %738 = vsyncadd [#allocation3], 4294967280 }
   0xb   :  { %10 = sfence }
   0xc   :  { %11 = vsyncpa [#allocation6], 0 }
   0xd   :  { %13 = vsyncpa [#allocation6 + $0x1], 0  ;;  %s818_s19 = smov 0   ;;  %s820_s20 = smov 0  }
   0xe   :  { %s822_s21 = smov 0  }
   0xf LB: > { %s345_s0 = sadd.s32 4294967295, %s785_s21   ;;  %s835_s22 = sadd.s32 1, %s785_s21   ;;  %s785_s21 = sphi %s822_s21, %s1193_s21   ;;  %s781_s20 = sphi %s820_s20, %s1192_s20   ;;  %s777_s19 = sphi %s818_s19, %s1191_s19  }
  0x10   : > { %s22_s23 = ssub.s32 %s785_s21, %s835_s22  ;;  %s25_s24 = sadd.s32 1, %s781_s20 }
  0x11   : > { %p23_p3 = scmp.eq.s32.totalorder %s22_s23, 0  ;;  %p346_p4 = scmp.ne.s32.totalorder %s22_s23, 0 }
  0x12   : > { %p29_p5 = scmp.eq.s32.totalorder %s785_s21, 1  ;;  %p34_p6 = scmp.ne.s32.totalorder %s781_s20, %s777_s19 }
  0x13   : > { %s844_s25 = scalar_select %p23_p3, %s781_s20, %s25_s24  }
  0x14   : > { %p846_p7 = por %p346_p4, %p29_p5  ;;  %p35_p8 = scmp.eq.s32.totalorder %s345_s0, 1 }
  0x15   : > { %p432_p9 = scmp.lt.s32.totalorder %s785_s21, 2  ;;  %s49_s28 = sand.u32 1, %s781_s20  }
  0x16   : > { %s1185_s26 = scalar_select %p846_p7, 1, 0 }
  0x17   : > { %p851_p10 = por %p35_p8, %p34_p6  ;;  %s348_s29 = sshll.u32 %s49_s28, 6 }
  0x18   : > { %s859_s30 = sshll.u32 %s785_s21, 3  ;;  %s867_s6 = scalar_lea.vmem [#allocation5], %s348_s29 }
  0x19   : > { %s1186_s27 = scalar_select %p851_p10, 1, 0 }
  0x1a   : > { %s69_s3 = sadd.s32 1, %s859_s30  ;;  %s65_s7 = sshll.u32 %s867_s6, 4  ;;  %s871_s7 = int_to_ptr.vmem [resolvable:$true] %s65_s7 }
  0x1b   : > { %s393_s4 = scalar_select %p432_p9, [#allocation4], [#allocation25] }
  0x1c   : > { %s394_s5 = scalar_select %p432_p9, %s859_s30, 0 }
  0x1d   : > { %s74_s8 = scalar_lea.vmem %s867_s6, 8 [#allocation5]  ;;  %s1195_s3 = smov (!%p432_p9, %s69_s3), 0 }
  0x1e   : > { %s54_s9 = sld [smem:[%s393_s4 + %s394_s5]]  ;;  %s83_s11 = sshll.u32 %s74_s8, 4  ;;  %s880_s11 = int_to_ptr.vmem [resolvable:$true] %s83_s11 }
  0x1f   : > { %s396_s10 = scalar_select %p432_p9, [#allocation4], [#allocation26] }
  0x20   : > { %s87_s12 = sadd.s32 2, %s859_s30  ;;  %s92_s16 = scalar_lea.vmem %s867_s6, 16 [#allocation5] }
  0x21   : > { %s878_s13 = sld [smem:[%s396_s10 + %s1195_s3]]  ;;  %s101_s23 = sshll.u32 %s92_s16, 4  ;;  %s924_s23 = int_to_ptr.vmem [resolvable:$true] %s101_s23 }
  0x22   : > { %s884_s14 = scalar_select %p432_p9, [#allocation4], [#allocation27] }
  0x23   : > { %s895_s4 = scalar_lea.hbm %s1182_s1, 65536 }
  0x24   : > { %s380_s15 = sshll.u32 %s54_s9, 7 }
  0x25   : > { %s57_s0 = scalar_lea.hbm %s1182_s1, %s380_s15 }
  0x26   : > { %s471_s24 = scalar_lea.hbm %s57_s0, 128  ;;  %p476_p0 = scmp.lt.u32.totalorder %s57_s0, %s1182_s1 }
  0x27   : > { %p472_p11 = scmp.ne.s32.totalorder %s57_s0, %s471_s24  ;;  %p477_p1 = scmp.lt.u32.totalorder %s895_s4, %s471_s24 }
  0x28   : > { %p479_p3 = scmp.lt.u32.totalorder %s471_s24, %s57_s0 }
  0x29   : > { %p473_p12 = pnand %p472_p11, %p432_p9  ;;  %p478_p2 = por %p477_p1, %p476_p0 }
  0x2b   : > { %p474_p13 = pneg %p473_p12  ;;  %p480_p4 = por %p479_p3, %p478_p2 }
  0x2d   : > { %p481_p5 = pnand %p480_p4, %p474_p13 }
  0x2f   : > { %484 = shalt.err (!%p481_p5)  }
  0x30   : > { %s485_s9 = scalar_lea.vmem %s871_s7, 128  ;;  %s788_s10 = smov [#allocation5]  }
  0x31   : > { %p486_p6 = scmp.ne.s32.totalorder %s871_s7, %s485_s9  ;;  %s489_s15 = sshll.u32 %s788_s10, 4  ;;  %s905_s15 = int_to_ptr.vmem [resolvable:$false] %s489_s15 }
  0x32   : > { %s908_s16 = scalar_lea.vmem %s905_s15, 2048  ;;  %p1184_p12 = scmp.lt.s32.totalorder %s871_s7, %s905_s15 }
  0x33   : > { %p487_p8 = pnand %p486_p6, %p432_p9  ;;  %p493_p13 = scmp.lt.s32.totalorder %s908_s16, %s485_s9 }
  0x35   : > { %p488_p11 = pneg %p487_p8  ;;  %p494_p0 = por %p493_p13, %p1184_p12 }
  0x37   : > { %p495_p1 = pnand %p494_p0, %p488_p11 }
  0x39   : > { %498 = shalt.err (!%p495_p1)  }
  0x3a   : > { %395 = dma.hbm_to_vmem [thread:$0]  (%p432_p9), %s57_s0, 128, %s871_s7, [#allocation2] }
  0x3b   : > { %s1197_s12 = smov (!%p432_p9, %s87_s12), 0  ;;  %s381_s17 = sshll.u32 %s878_s13, 7 }
  0x3c   : > { %s73_s29 = scalar_lea.hbm %s1182_s1, %s381_s17  ;;  %s930_s3 = sld [smem:[%s884_s14 + %s1197_s12]] }
  0x3d   : > { %s499_s5 = scalar_lea.hbm %s73_s29, 128  ;;  %p504_p5 = scmp.lt.u32.totalorder %s73_s29, %s1182_s1 }
  0x3e   : > { %p500_p2 = scmp.ne.s32.totalorder %s73_s29, %s499_s5  ;;  %p505_p6 = scmp.lt.u32.totalorder %s895_s4, %s499_s5 }
  0x3f   : > { %p507_p11 = scmp.lt.u32.totalorder %s499_s5, %s73_s29 }
  0x40   : > { %p501_p3 = pnand %p500_p2, %p432_p9  ;;  %p506_p8 = por %p505_p6, %p504_p5 }
  0x42   : > { %p502_p4 = pneg %p501_p3  ;;  %p508_p13 = por %p507_p11, %p506_p8 }
  0x44   : > { %p509_p0 = pnand %p508_p13, %p502_p4 }
  0x46   : > { %512 = shalt.err (!%p509_p0)  }
  0x47   : > { %s513_s12 = scalar_lea.vmem %s880_s11, 128  ;;  %p520_p12 = scmp.lt.s32.totalorder %s880_s11, %s905_s15 }
  0x48   : > { %p514_p1 = scmp.ne.s32.totalorder %s880_s11, %s513_s12  ;;  %p521_p10 = scmp.lt.s32.totalorder %s908_s16, %s513_s12 }
  0x4a   : > { %p515_p2 = pnand %p514_p1, %p432_p9  ;;  %p522_p7 = por %p521_p10, %p520_p12 }
  0x4c   : > { %p516_p3 = pneg %p515_p2 }
  0x4e   : > { %p523_p5 = pnand %p522_p7, %p516_p3 }
  0x50   : > { %526 = shalt.err (!%p523_p5)  }
  0x51   : > { %398 = dma.hbm_to_vmem [thread:$0]  (%p432_p9), %s73_s29, 128, %s880_s11, [#allocation2 + $0x1] }
  0x52   : > { %s105_s13 = sadd.s32 3, %s859_s30  ;;  %s110_s14 = scalar_lea.vmem %s867_s6, 24 [#allocation5] }
  0x53   : > { %s402_s0 = scalar_select %p432_p9, [#allocation4], [#allocation28] }
  0x54   : > { %s1199_s13 = smov (!%p432_p9, %s105_s13), 0  ;;  %s119_s10 = sshll.u32 %s110_s14, 4  ;;  %s961_s10 = int_to_ptr.vmem [resolvable:$true] %s119_s10 }
  0x55   : > { %s123_s17 = sadd.s32 4, %s859_s30  ;;  %s382_s18 = sshll.u32 %s930_s3, 7 }
  0x56   : > { %s956_s24 = sld [smem:[%s402_s0 + %s1199_s13]]  ;;  %s91_s9 = scalar_lea.hbm %s1182_s1, %s382_s18 }
  0x57   : > { %s527_s12 = scalar_lea.hbm %s91_s9, 128  ;;  %p532_p4 = scmp.lt.u32.totalorder %s91_s9, %s1182_s1 }
  0x58   : > { %p528_p7 = scmp.ne.s32.totalorder %s91_s9, %s527_s12  ;;  %p533_p6 = scmp.lt.u32.totalorder %s895_s4, %s527_s12 }
  0x59   : > { %p535_p11 = scmp.lt.u32.totalorder %s527_s12, %s91_s9 }
  0x5a   : > { %p529_p10 = pnand %p528_p7, %p432_p9  ;;  %p534_p8 = por %p533_p6, %p532_p4 }
  0x5c   : > { %p530_p12 = pneg %p529_p10  ;;  %p536_p13 = por %p535_p11, %p534_p8 }
  0x5e   : > { %p537_p0 = pnand %p536_p13, %p530_p12 }
  0x60   : > { %540 = shalt.err (!%p537_p0)  }
  0x61   : > { %s541_s3 = scalar_lea.vmem %s924_s23, 128  ;;  %p548_p5 = scmp.lt.s32.totalorder %s924_s23, %s905_s15 }
  0x62   : > { %p542_p1 = scmp.ne.s32.totalorder %s924_s23, %s541_s3  ;;  %p549_p7 = scmp.lt.s32.totalorder %s908_s16, %s541_s3 }
  0x64   : > { %p543_p2 = pnand %p542_p1, %p432_p9  ;;  %p550_p10 = por %p549_p7, %p548_p5 }
  0x66   : > { %p544_p3 = pneg %p543_p2 }
  0x68   : > { %p551_p4 = pnand %p550_p10, %p544_p3 }
  0x6a   : > { %554 = shalt.err (!%p551_p4)  }
  0x6b   : > { %401 = dma.hbm_to_vmem [thread:$0]  (%p432_p9), %s91_s9, 128, %s924_s23, [#allocation2 + $0x2] }
  0x6c   : > { %s405_s13 = scalar_select %p432_p9, [#allocation4], [#allocation29] }
  0x6d   : > { %s1201_s17 = smov (!%p432_p9, %s123_s17), 0  ;;  %s128_s14 = scalar_lea.vmem %s867_s6, 32 [#allocation5] }
  0x6e   : > { %s141_s0 = sadd.s32 5, %s859_s30  ;;  %s383_s18 = sshll.u32 %s956_s24, 7 }
  0x6f   : > { %s986_s5 = sld [smem:[%s405_s13 + %s1201_s17]]  ;;  %s109_s11 = scalar_lea.hbm %s1182_s1, %s383_s18 }
  0x70   : > { %s137_s29 = sshll.u32 %s128_s14, 4  ;;  %s555_s3 = scalar_lea.hbm %s109_s11, 128  ;;  %s138_s29 = int_to_ptr.vmem [resolvable:$true] %s137_s29 }
  0x71   : > { %p556_p12 = scmp.ne.s32.totalorder %s109_s11, %s555_s3  ;;  %p560_p11 = scmp.lt.u32.totalorder %s109_s11, %s1182_s1 }
  0x72   : > { %p561_p13 = scmp.lt.u32.totalorder %s895_s4, %s555_s3  ;;  %p563_p1 = scmp.lt.u32.totalorder %s555_s3, %s109_s11 }
  0x73   : > { %p557_p6 = pnand %p556_p12, %p432_p9 }
  0x74   : > { %p562_p0 = por %p561_p13, %p560_p11 }
  0x75   : > { %p558_p8 = pneg %p557_p6 }
  0x76   : > { %p564_p2 = por %p563_p1, %p562_p0 }
  0x78   : > { %p565_p3 = pnand %p564_p2, %p558_p8 }
  0x7a   : > { %568 = shalt.err (!%p565_p3)  }
  0x7b   : > { %s569_s17 = scalar_lea.vmem %s961_s10, 128  ;;  %p576_p4 = scmp.lt.s32.totalorder %s961_s10, %s905_s15 }
  0x7c   : > { %p570_p5 = scmp.ne.s32.totalorder %s961_s10, %s569_s17  ;;  %p577_p12 = scmp.lt.s32.totalorder %s908_s16, %s569_s17 }
  0x7e   : > { %p571_p7 = pnand %p570_p5, %p432_p9  ;;  %p578_p6 = por %p577_p12, %p576_p4 }
  0x80   : > { %p572_p10 = pneg %p571_p7 }
  0x82   : > { %p579_p11 = pnand %p578_p6, %p572_p10 }
  0x84   : > { %582 = shalt.err (!%p579_p11)  }
  0x85   : > { %404 = dma.hbm_to_vmem [thread:$0]  (%p432_p9), %s109_s11, 128, %s961_s10, [#allocation2 + $0x3] }
  0x86   : > { %s146_s24 = scalar_lea.vmem %s867_s6, 40 [#allocation5]  ;;  %s1203_s0 = smov (!%p432_p9, %s141_s0), 0 }
  0x87   : > { %s408_s13 = scalar_select %p432_p9, [#allocation4], [#allocation30] }
  0x88   : > { %s384_s14 = sshll.u32 %s986_s5, 7  ;;  %s155_s18 = sshll.u32 %s146_s24, 4  ;;  %s1030_s18 = int_to_ptr.vmem [resolvable:$true] %s155_s18 }
  0x89   : > { %s127_s3 = scalar_lea.hbm %s1182_s1, %s384_s14  ;;  %s1016_s23 = sld [smem:[%s408_s13 + %s1203_s0]] }
  0x8a   : > { %s583_s9 = scalar_lea.hbm %s127_s3, 128  ;;  %p588_p1 = scmp.lt.u32.totalorder %s127_s3, %s1182_s1 }
  0x8b   : > { %p584_p8 = scmp.ne.s32.totalorder %s127_s3, %s583_s9  ;;  %p589_p2 = scmp.lt.u32.totalorder %s895_s4, %s583_s9 }
  0x8c   : > { %p591_p5 = scmp.lt.u32.totalorder %s583_s9, %s127_s3 }
  0x8d   : > { %p585_p13 = pnand %p584_p8, %p432_p9  ;;  %p590_p3 = por %p589_p2, %p588_p1 }
  0x8f   : > { %p586_p0 = pneg %p585_p13  ;;  %p592_p7 = por %p591_p5, %p590_p3 }
  0x91   : > { %p593_p10 = pnand %p592_p7, %p586_p0 }
  0x93   : > { %596 = shalt.err (!%p593_p10)  }
  0x94   : > { %s597_s5 = scalar_lea.vmem %s138_s29, 128  ;;  %p604_p11 = scmp.lt.s32.totalorder %s138_s29, %s905_s15 }
  0x95   : > { %p598_p4 = scmp.ne.s32.totalorder %s138_s29, %s597_s5  ;;  %p605_p8 = scmp.lt.s32.totalorder %s908_s16, %s597_s5 }
  0x97   : > { %p599_p12 = pnand %p598_p4, %p432_p9  ;;  %p606_p13 = por %p605_p8, %p604_p11 }
  0x99   : > { %p600_p6 = pneg %p599_p12 }
  0x9b   : > { %p607_p1 = pnand %p606_p13, %p600_p6 }
  0x9d   : > { %610 = shalt.err (!%p607_p1)  }
  0x9e   : > { %407 = dma.hbm_to_vmem [thread:$0]  (%p432_p9), %s127_s3, 128, %s138_s29, [#allocation2 + $0x4] }
  0x9f   : > { %s159_s0 = sadd.s32 6, %s859_s30  ;;  %s164_s24 = scalar_lea.vmem %s867_s6, 48 [#allocation5] }
  0xa0   : > { %s411_s17 = scalar_select %p432_p9, [#allocation4], [#allocation31] }
  0xa1   : > { %s1205_s0 = smov (!%p432_p9, %s159_s0), 0  ;;  %s177_s13 = sadd.s32 7, %s859_s30 }
  0xa2   : > { %s385_s14 = sshll.u32 %s1016_s23, 7  ;;  %s1040_s8 = sld [smem:[%s411_s17 + %s1205_s0]] }
  0xa3   : > { %s145_s10 = scalar_lea.hbm %s1182_s1, %s385_s14  ;;  %s173_s11 = sshll.u32 %s164_s24, 4  ;;  %s174_s11 = int_to_ptr.vmem [resolvable:$true] %s173_s11 }
  0xa4   : > { %s611_s5 = scalar_lea.hbm %s145_s10, 128  ;;  %p616_p5 = scmp.lt.u32.totalorder %s145_s10, %s1182_s1 }
  0xa5   : > { %p612_p0 = scmp.ne.s32.totalorder %s145_s10, %s611_s5  ;;  %p617_p7 = scmp.lt.u32.totalorder %s895_s4, %s611_s5 }
  0xa6   : > { %p619_p4 = scmp.lt.u32.totalorder %s611_s5, %s145_s10 }
  0xa7   : > { %p613_p2 = pnand %p612_p0, %p432_p9  ;;  %p618_p10 = por %p617_p7, %p616_p5 }
  0xa9   : > { %p614_p3 = pneg %p613_p2  ;;  %p620_p12 = por %p619_p4, %p618_p10 }
  0xab   : > { %p621_p6 = pnand %p620_p12, %p614_p3 }
  0xad   : > { %624 = shalt.err (!%p621_p6)  }
  0xae   : > { %s625_s30 = scalar_lea.vmem %s1030_s18, 128  ;;  %p632_p1 = scmp.lt.s32.totalorder %s1030_s18, %s905_s15 }
  0xaf   : > { %p626_p11 = scmp.ne.s32.totalorder %s1030_s18, %s625_s30  ;;  %p633_p0 = scmp.lt.s32.totalorder %s908_s16, %s625_s30 }
  0xb1   : > { %p627_p8 = pnand %p626_p11, %p432_p9  ;;  %p634_p2 = por %p633_p0, %p632_p1 }
  0xb3   : > { %p628_p13 = pneg %p627_p8 }
  0xb5   : > { %p635_p5 = pnand %p634_p2, %p628_p13 }
  0xb7   : > { %638 = shalt.err (!%p635_p5)  }
  0xb8   : > { %410 = dma.hbm_to_vmem [thread:$0]  (%p432_p9), %s145_s10, 128, %s1030_s18, [#allocation2 + $0x5] }
  0xb9   : > { %s414_s23 = scalar_select %p432_p9, [#allocation4], [#allocation32] }
  0xba   : > { %s1207_s13 = smov (!%p432_p9, %s177_s13), 0  ;;  %s386_s0 = sshll.u32 %s1040_s8, 7 }
  0xbb   : > { %s182_s17 = scalar_lea.vmem %s867_s6, 56 [#allocation5]  ;;  %s163_s12 = scalar_lea.hbm %s1182_s1, %s386_s0 }
  0xbc   : > { %s178_s9 = sld [smem:[%s414_s23 + %s1207_s13]]  ;;  %s639_s5 = scalar_lea.hbm %s163_s12, 128 }
  0xbd   : > { %p640_p3 = scmp.ne.s32.totalorder %s163_s12, %s639_s5  ;;  %p644_p4 = scmp.lt.u32.totalorder %s163_s12, %s1182_s1 }
  0xbe   : > { %p645_p12 = scmp.lt.u32.totalorder %s895_s4, %s639_s5  ;;  %p647_p11 = scmp.lt.u32.totalorder %s639_s5, %s163_s12 }
  0xbf   : > { %p641_p7 = pnand %p640_p3, %p432_p9 }
  0xc0   : > { %p646_p6 = por %p645_p12, %p644_p4 }
  0xc1   : > { %p642_p10 = pneg %p641_p7 }
  0xc2   : > { %p648_p8 = por %p647_p11, %p646_p6 }
  0xc4   : > { %p649_p13 = pnand %p648_p8, %p642_p10 }
  0xc6   : > { %652 = shalt.err (!%p649_p13)  }
  0xc7   : > { %s653_s6 = scalar_lea.vmem %s174_s11, 128  ;;  %p660_p5 = scmp.lt.s32.totalorder %s174_s11, %s905_s15 }
  0xc8   : > { %p654_p1 = scmp.ne.s32.totalorder %s174_s11, %s653_s6  ;;  %p661_p3 = scmp.lt.s32.totalorder %s908_s16, %s653_s6 }
  0xca   : > { %p655_p0 = pnand %p654_p1, %p432_p9  ;;  %p662_p7 = por %p661_p3, %p660_p5 }
  0xcc   : > { %p656_p2 = pneg %p655_p0 }
  0xce   : > { %p663_p4 = pnand %p662_p7, %p656_p2 }
  0xd0   : > { %666 = shalt.err (!%p663_p4)  }
  0xd1   : > { %413 = dma.hbm_to_vmem [thread:$0]  (%p432_p9), %s163_s12, 128, %s174_s11, [#allocation2 + $0x6] }
  0xd2   : > { %s191_s18 = sshll.u32 %s182_s17, 4  ;;  %s387_s13 = sshll.u32 %s178_s9, 7  ;;  %s192_s18 = int_to_ptr.vmem [resolvable:$true] %s191_s18 }
  0xd3   : > { %s181_s30 = scalar_lea.hbm %s1182_s1, %s387_s13 }
  0xd4   : > { %s667_s23 = scalar_lea.hbm %s181_s30, 128  ;;  %p672_p11 = scmp.lt.u32.totalorder %s181_s30, %s1182_s1 }
  0xd5   : > { %p668_p10 = scmp.ne.s32.totalorder %s181_s30, %s667_s23  ;;  %p673_p8 = scmp.lt.u32.totalorder %s895_s4, %s667_s23 }
  0xd6   : > { %p675_p1 = scmp.lt.u32.totalorder %s667_s23, %s181_s30 }
  0xd7   : > { %p669_p12 = pnand %p668_p10, %p432_p9  ;;  %p674_p13 = por %p673_p8, %p672_p11 }
  0xd9   : > { %p670_p6 = pneg %p669_p12  ;;  %p676_p0 = por %p675_p1, %p674_p13 }
  0xdb   : > { %p677_p2 = pnand %p676_p0, %p670_p6 }
  0xdd   : > { %680 = shalt.err (!%p677_p2)  }
  0xde   : > { %s681_s11 = scalar_lea.vmem %s192_s18, 128  ;;  %p688_p4 = scmp.lt.s32.totalorder %s192_s18, %s905_s15 }
  0xdf   : > { %p682_p5 = scmp.ne.s32.totalorder %s192_s18, %s681_s11  ;;  %p689_p10 = scmp.lt.s32.totalorder %s908_s16, %s681_s11 }
  0xe1   : > { %p683_p3 = pnand %p682_p5, %p432_p9  ;;  %p690_p12 = por %p689_p10, %p688_p4 }
  0xe3   : > { %p684_p7 = pneg %p683_p3 }
  0xe5   : > { %p691_p8 = pnand %p690_p12, %p684_p7 }
  0xe7   : > { %694 = shalt.err (!%p691_p8)  }
  0xe8   : > { %416 = dma.hbm_to_vmem [thread:$0]  (%p432_p9), %s181_s30, 128, %s192_s18, [#allocation2 + $0x7] }
  0xe9   : > { %740 = dma.done.wait (%p432_p9), [#allocation2], 128 }
  0xea   : > { %742 = vsyncadd (%p432_p9), [#allocation2], 4294967168 }
  0xeb   : > { %744 = dma.done.wait (%p432_p9), [#allocation2 + $0x1], 128 }
  0xec   : > { %746 = vsyncadd (%p432_p9), [#allocation2 + $0x1], 4294967168 }
  0xed   : > { %748 = dma.done.wait (%p432_p9), [#allocation2 + $0x2], 128 }
  0xee   : > { %750 = vsyncadd (%p432_p9), [#allocation2 + $0x2], 4294967168 }
  0xef   : > { %752 = dma.done.wait (%p432_p9), [#allocation2 + $0x3], 128 }
  0xf0   : > { %754 = vsyncadd (%p432_p9), [#allocation2 + $0x3], 4294967168 }
  0xf1   : > { %756 = dma.done.wait (%p432_p9), [#allocation2 + $0x4], 128 }
  0xf2   : > { %758 = vsyncadd (%p432_p9), [#allocation2 + $0x4], 4294967168 }
  0xf3   : > { %760 = dma.done.wait (%p432_p9), [#allocation2 + $0x5], 128 }
  0xf4   : > { %762 = vsyncadd (%p432_p9), [#allocation2 + $0x5], 4294967168 }
  0xf5   : > { %764 = dma.done.wait (%p432_p9), [#allocation2 + $0x6], 128 }
  0xf6   : > { %766 = vsyncadd (%p432_p9), [#allocation2 + $0x6], 4294967168 }
  0xf7   : > { %768 = dma.done.wait (%p432_p9), [#allocation2 + $0x7], 128 }
  0xf8   : > { %770 = vsyncadd (%p432_p9), [#allocation2 + $0x7], 4294967168  ;;  %s389_s4 = sshll.u32 %s785_s21, 10  ;;  %p1187_p6 = scmp.ne.s32.totalorder %s1185_s26, 0 }
  0xf9   : > { %s1133_s12 = scalar_lea.hbm %s1183_s2, %s389_s4  ;;  %s214_s5 = scalar_lea.sflag [#allocation6], %s49_s28 }
  0xfa   : > { %p1139_p11 = pnand %p432_p9, %p1187_p6  ;;  %s695_s29 = scalar_lea.vmem %s871_s7, 1024 }
  0xfb   : > { %p696_p13 = scmp.ne.s32.totalorder %s871_s7, %s695_s29  ;;  %p704_p5 = scmp.lt.s32.totalorder %s908_s16, %s695_s29 }
  0xfc   : > { %p697_p1 = pneg %p1139_p11  ;;  %p1189_p3 = scmp.lt.s32.totalorder %s871_s7, %s905_s15 }
  0xfe   : > { %p698_p0 = pnand %p697_p1, %p696_p13  ;;  %p705_p7 = por %p704_p5, %p1189_p3 }
 0x100   : > { %p699_p2 = pneg %p698_p0 }
 0x102   : > { %p706_p4 = pnand %p705_p7, %p699_p2 }
 0x104   : > { %709 = shalt.err (!%p706_p4)
}
 0x105   : > { %s710_s26 = scalar_lea.hbm %s1133_s12, 1024  ;;  %s715_s6 = scalar_lea.hbm %s1183_s2, 2048 }
 0x106   : > { %p711_p9 = scmp.ne.s32.totalorder %s1133_s12, %s710_s26  ;;  %p716_p8 = scmp.lt.u32.totalorder %s1133_s12, %s1183_s2 }
 0x107   : > { %p717_p6 = scmp.lt.u32.totalorder %s715_s6, %s710_s26  ;;  %p719_p0 = scmp.lt.u32.totalorder %s710_s26, %s1133_s12 }
 0x108   : > { %p713_p10 = pnand %p711_p9, %p697_p1 }
 0x109   : > { %p718_p13 = por %p717_p6, %p716_p8 }
 0x10a   : > { %p714_p12 = pneg %p713_p10 }
 0x10b   : > { %p720_p2 = por %p719_p0, %p718_p13 }
 0x10d   : > { %p721_p5 = pnand %p720_p2, %p714_p12 }
 0x10f   : > { %724 = shalt.err (!%p721_p5)
}
 0x110   : > { %s789_s15 = smov 128   ;;  %s790_s16 = smov 8  }
 0x111   : > { %427 = dma.vmem_to_hbm [thread:$0]  (!%p1139_p11), %s871_s7, 1024, %s1133_s12, %s214_s5, %s789_s15, %s789_s15, %s790_s16  }
 0x112   : > { %p433_p1 = scmp.ge.s32.totalorder %s785_s21, 1  ;;  %s243_s8 = sand.u32 1, %s777_s19  }
 0x113   : > { %p1190_p3 = scmp.ne.s32.totalorder %s1186_s27, 0  ;;  %s244_s10 = scalar_lea.sflag [#allocation6], %s243_s8 }
 0x115   : > { %p429_p7 = pnand %p433_p1, %p1190_p3 }
 0x117   : > { %772 = dma.done.wait (!%p429_p7), %s244_s10, 1024  }
 0x118   : > { %774 = vsyncadd (!%p429_p7), %s244_s10, 4294966272  ;;  %p16_p4 = scmp.ge.s32.totalorder %s835_s22, 3   ;;  %s1191_s19 = smov %s781_s20 }
 0x119   : > { %s1192_s20 = smov %s844_s25  ;;  %s1193_s21 = smov %s835_s22 }
 0x11a   :  { %18 = sbr.rel (!%p16_p4) target bundleno = 15 (0xf), region = 105 }
 0x121   :  { %249 = vsyncpa [#allocation6], 1 }
 0x122   :  { %251 = vsyncpa [#allocation6 + $0x1], 1 }
 0x123   :  { %252 = vsyncmov [#allocation2] }
 0x126   :  { %s253_s21 = vpop.sfrf %252 }
 0x127   :  { %p372_p11 = scmp.ne.s32.totalorder %s253_s21, 0 }
 0x129   :  { %257 = shalt.err (%p372_p11)  }
 0x12a   :  { %259 = vsyncmov [#allocation2 + $0x1] }
 0x12d   :  { %s260_s27 = vpop.sfrf %259 }
 0x12e   :  { %p373_p9 = scmp.ne.s32.totalorder %s260_s27, 0 }
 0x130   :  { %264 = shalt.err (%p373_p9)  }
 0x131   :  { %266 = vsyncmov [#allocation2 + $0x2] }
 0x134   :  { %s267_s7 = vpop.sfrf %266 }
 0x135   :  { %p374_p10 = scmp.ne.s32.totalorder %s267_s7, 0 }
 0x137   :  { %271 = shalt.err (%p374_p10)  }
 0x138   :  { %273 = vsyncmov [#allocation2 + $0x3] }
 0x13b   :  { %s274_s30 = vpop.sfrf %273 }
 0x13c   :  { %p375_p12 = scmp.ne.s32.totalorder %s274_s30, 0 }
 0x13e   :  { %278 = shalt.err (%p375_p12)  }
 0x13f   :  { %280 = vsyncmov [#allocation2 + $0x4] }
 0x142   :  { %s281_s22 = vpop.sfrf %280 }
 0x143   :  { %p376_p8 = scmp.ne.s32.totalorder %s281_s22, 0 }
 0x145   :  { %285 = shalt.err (%p376_p8)  }
 0x146   :  { %287 = vsyncmov [#allocation2 + $0x5] }
 0x149   :  { %s288_s1 = vpop.sfrf %287 }
 0x14a   :  { %p377_p6 = scmp.ne.s32.totalorder %s288_s1, 0 }
 0x14c   :  { %292 = shalt.err (%p377_p6)  }
 0x14d   :  { %294 = vsyncmov [#allocation2 + $0x6] }
 0x150   :  { %s295_s2 = vpop.sfrf %294 }
 0x151   :  { %p378_p13 = scmp.ne.s32.totalorder %s295_s2, 0 }
 0x153   :  { %299 = shalt.err (%p378_p13)  }
 0x154   :  { %301 = vsyncmov [#allocation2 + $0x7] }
 0x157   :  { %s302_s19 = vpop.sfrf %301 }
 0x158   :  { %p379_p0 = scmp.ne.s32.totalorder %s302_s19, 0 }
 0x15a   :  { %306 = shalt.err (%p379_p0)  }

</bundles_post_ra>
